<compile_context>
chip_gen: v7x
topology: tpu7x:2x2x1
jax: 0.10.0
libtpu: 0.0.40
codegen_flags: <defaults>
</compile_context>

<pallas_src>
import functools
import math

import jax
import jax.numpy as jnp
from jax import lax
from jax.experimental import pallas as pl
from jax.experimental.pallas import tpu as pltpu


# --------------------------------------------------------------------------------------
# helpers
# --------------------------------------------------------------------------------------
_LANE, _SUB = 128, 8


def _round_up(x: int, m: int) -> int:
    return (x + m - 1) // m * m


def _vmem_limit(est_bytes: int) -> int:
    """Generation-aware VMEM cap: honest estimate, clamped below physical with headroom."""
    try:
        cap = int(pltpu.get_tpu_info().vmem_capacity_bytes)
    except Exception:
        cap = 64 * 1024 * 1024                      # conservative default (v7x per-TC)
    ceiling = max(cap - 16 * 1024 * 1024, 32 * 1024 * 1024)   # leave Mosaic scratch headroom
    return int(min(max(est_bytes, 32 * 1024 * 1024), ceiling))


# --------------------------------------------------------------------------------------
# kernel 1: K / V in-projection (runs once per token, head-batched output)
# --------------------------------------------------------------------------------------
def _kv_proj_kernel(k_ref, v_ref, wk_ref, bk_ref, wv_ref, bv_ref,
                    kp_ref, vp_ref, *, num_heads: int):
    xk = k_ref[0]                                            # (TS, E)
    xv = v_ref[0]                                            # (TS, E)
    for h in range(num_heads):
        kp_ref[0, h] = (jnp.dot(xk, wk_ref[h], preferred_element_type=jnp.float32)
                        + bk_ref[h]).astype(kp_ref.dtype)
        vp_ref[0, h] = (jnp.dot(xv, wv_ref[h], preferred_element_type=jnp.float32)
                        + bv_ref[h]).astype(vp_ref.dtype)


# --------------------------------------------------------------------------------------
# kernel 2: flash-style multi-head attention (+ optional residual / LayerNorm)
# --------------------------------------------------------------------------------------
def _mha_flash_kernel(q_ref, kp_ref, vp_ref,
                      wq_ref, bq_ref, wo_ref, bo_ref, g1_ref, b1_ref,
                      o_ref,
                      qh_sc, m_sc, l_sc, acc_sc,
                      *, num_heads: int, add_skip: bool, ln_eps: float, kv_len: int):
    H = num_heads
    TK = kp_ref.shape[2]
    cdt = q_ref.dtype                                        # MXU operand dtype
    ki = pl.program_id(2)

    @pl.when(ki == 0)
    def _():
        # Project the resident Q tile once per (b, q-tile); 1/sqrt(dh) already folded into
        # wq/bq by the wrapper.  Per-head weight is a free leading-axis index.
        xq = q_ref[0]                                        # (TQ, E)
        for h in range(H):
            qh_sc[h] = (jnp.dot(xq, wq_ref[h], preferred_element_type=jnp.float32)
                        + bq_ref[h]).astype(cdt)
        m_sc[...] = jnp.full(m_sc.shape, -jnp.inf, m_sc.dtype)
        l_sc[...] = jnp.zeros(l_sc.shape, l_sc.dtype)
        acc_sc[...] = jnp.zeros(acc_sc.shape, acc_sc.dtype)

    kh = kp_ref[0]                                           # (H, TK, dh)
    vh = vp_ref[0]                                           # (H, TK, dh)
    qh = qh_sc[...]                                          # (H, TQ, dh)

    s = jnp.einsum('hqd,hkd->hqk', qh, kh,
                   preferred_element_type=jnp.float32)       # (H, TQ, TK) f32

    if kv_len % TK != 0:
        # Mask the padded tail of the last KV tile; also zero its V rows so 0 * garbage
        # cannot inject NaN/Inf into the PV accumulation.
        col = ki * TK + lax.broadcasted_iota(jnp.int32, (1, TK), 1)   # (1, TK)
        valid = col < kv_len
        s = jnp.where(valid[:, None, :], s, -jnp.inf)
        vh = jnp.where(valid[0][:, None], vh, jnp.zeros_like(vh))

    # online softmax update (f32 elementwise math)
    m_prev = m_sc[...]
    m_new = jnp.maximum(m_prev, s.max(axis=-1, keepdims=True))
    alpha = jnp.exp(m_prev - m_new)
    p = jnp.exp(s - m_new)
    l_sc[...] = alpha * l_sc[...] + p.sum(axis=-1, keepdims=True)
    acc_sc[...] = alpha * acc_sc[...] + jnp.einsum(
        'hqk,hkd->hqd', p.astype(cdt), vh, preferred_element_type=jnp.float32)
    m_sc[...] = m_new
    # TODO(synk): attention-weight dropout (p=0.1) is identity in eval mode.

    @pl.when(ki == pl.num_programs(2) - 1)
    def _():
        # Softmax denominator applied AFTER the PV matmul: (TQ, dh) multiply per head
        # instead of a (TQ, S) probability rescale.  pl.reciprocal -> EUP slot.
        inv_l = pl.reciprocal(l_sc[...], approx=True)        # (H, TQ, 1)
        y = bo_ref[...]                                      # (1, E) f32, broadcasts
        for h in range(H):
            ctx_h = (acc_sc[h] * inv_l[h]).astype(cdt)       # (TQ, dh)
            y = y + jnp.dot(ctx_h, wo_ref[h], preferred_element_type=jnp.float32)
        if add_skip:
            # q + dropout(attn_out); dropout identity at inference.  LayerNorm in f32.
            y = q_ref[0].astype(jnp.float32) + y
            mu = jnp.mean(y, axis=-1, keepdims=True)
            var = jnp.mean((y - mu) ** 2, axis=-1, keepdims=True)
            y = (y - mu) * lax.rsqrt(var + ln_eps)
            y = y * g1_ref[...] + b1_ref[...]
        o_ref[0] = y.astype(o_ref.dtype)


# --------------------------------------------------------------------------------------
# wrapper
# --------------------------------------------------------------------------------------
def encoder_block_v3(q, k, v, params, *, num_heads: int, add_skip: bool,
                     ln_eps: float = 1e-5, q_tile: int = 256, kv_tile: int = 512,
                     proj_tile: int = 512):
    """Pallas implementation of EncoderBlockV3.forward (inference)."""
    B, Sq, E = q.shape
    Bk, Skv, Ek = k.shape
    assert (Bk, Ek) == (B, E) and v.shape == k.shape
    H = num_heads
    assert E % H == 0, "embed_dim must be divisible by num_heads"
    dh = E // H
    cdt = q.dtype
    itemsize = jnp.dtype(cdt).itemsize
    scale = 1.0 / math.sqrt(dh)
    f32 = jnp.float32

    # One-time XLA-side re-layout: pre-transposed, head-batched weights ((H, in, out)) so
    # the kernels never transpose or lane-slice; 1/sqrt(dh) folded into wq / bq.
    wq_h = (params["wq"].astype(f32).T * scale).reshape(E, H, dh).transpose(1, 0, 2).astype(cdt)
    wk_h = params["wk"].astype(f32).T.reshape(E, H, dh).transpose(1, 0, 2).astype(cdt)
    wv_h = params["wv"].astype(f32).T.reshape(E, H, dh).transpose(1, 0, 2).astype(cdt)
    wo_h = params["wo"].astype(f32).T.reshape(H, dh, E).astype(cdt)
    bq_h = (params["bq"].astype(f32) * scale).reshape(H, 1, dh)
    bk_h = params["bk"].astype(f32).reshape(H, 1, dh)
    bv_h = params["bv"].astype(f32).reshape(H, 1, dh)
    bo = params["bo"].astype(f32).reshape(1, E)
    g1 = params["ln1_g"].astype(f32).reshape(1, E)
    b1 = params["ln1_b"].astype(f32).reshape(1, E)

    e_lp, dh_lp = _round_up(E, _LANE), _round_up(dh, _LANE)

    # ---------------- kernel 1: project K / V once (head-batched layout) ----------------
    TS = min(proj_tile, Skv)
    n_st = pl.cdiv(Skv, TS)
    ts_p = _round_up(TS, _SUB)
    proj_est = (2 * itemsize * (2 * ts_p * e_lp + 2 * H * ts_p * dh_lp)   # in/out blocks x2 bufs
                + 2 * (itemsize * 2 * H * _round_up(E, _SUB) * dh_lp      # wk / wv x2 bufs
                       + 4 * 2 * H * _SUB * dh_lp)                        # biases
                + 4 * 2 * H * ts_p * dh_lp                                # f32 projection temps
                + (2 << 20))

    kp, vp = pl.pallas_call(
        functools.partial(_kv_proj_kernel, num_heads=H),
        out_shape=(jax.ShapeDtypeStruct((B, H, Skv, dh), cdt),
                   jax.ShapeDtypeStruct((B, H, Skv, dh), cdt)),
        grid_spec=pltpu.PrefetchScalarGridSpec(
            num_scalar_prefetch=0,
            grid=(B, n_st),
            in_specs=[
                pl.BlockSpec((1, TS, E), lambda b, t: (b, t, 0)),
                pl.BlockSpec((1, TS, E), lambda b, t: (b, t, 0)),
                pl.BlockSpec((H, E, dh), lambda b, t: (0, 0, 0)),
                pl.BlockSpec((H, 1, dh), lambda b, t: (0, 0, 0)),
                pl.BlockSpec((H, E, dh), lambda b, t: (0, 0, 0)),
                pl.BlockSpec((H, 1, dh), lambda b, t: (0, 0, 0)),
            ],
            out_specs=[
                pl.BlockSpec((1, H, TS, dh), lambda b, t: (b, 0, t, 0)),
                pl.BlockSpec((1, H, TS, dh), lambda b, t: (b, 0, t, 0)),
            ],
        ),
        compiler_params=pltpu.CompilerParams(
            dimension_semantics=("parallel", "parallel"),
            vmem_limit_bytes=_vmem_limit(proj_est)),
        cost_estimate=pl.CostEstimate(
            flops=int(4 * B * Skv * E * E),
            transcendentals=0,
            bytes_accessed=int(itemsize * (4 * B * Skv * E + 2 * E * E + 2 * E))),
    )(k, v, wk_h, bk_h, wv_h, bv_h)

    # ---------------- kernel 2: flash attention + output proj (+ skip/LN) ---------------
    TQ = min(q_tile, Sq)
    TK = min(kv_tile, Skv)
    n_qt = pl.cdiv(Sq, TQ)
    n_kt = pl.cdiv(Skv, TK)

    tq_p, tk_p = _round_up(TQ, _SUB), _round_up(TK, _SUB)
    attn_est = (2 * itemsize * (2 * tq_p * e_lp + 2 * H * tk_p * dh_lp)     # q/out + Kp/Vp x2 bufs
                + 2 * itemsize * (H * _round_up(E, _SUB) * dh_lp
                                  + H * _round_up(dh, _SUB) * e_lp)         # wq, wo x2 bufs
                + 2 * 4 * (H * _SUB * dh_lp + 3 * _SUB * e_lp)              # bq, bo, g1, b1
                + H * tq_p * dh_lp * (itemsize + 4)                         # qh + acc scratch
                + 2 * 4 * H * tq_p * _LANE                                  # m, l scratch
                + 4 * (2 * H * tq_p * _round_up(TK, _LANE) + 2 * tq_p * e_lp)  # s/p + out temps
                + (2 << 20))
    # TODO(synk): pipeline_mode=pl.Buffered(1) on the constant weight specs would halve
    #             their double-buffered VMEM footprint once single-buffering is guaranteed
    #             by the installed Pallas version.

    kernel = functools.partial(_mha_flash_kernel, num_heads=H, add_skip=add_skip,
                               ln_eps=ln_eps, kv_len=Skv)

    out = pl.pallas_call(
        kernel,
        out_shape=jax.ShapeDtypeStruct((B, Sq, E), cdt),
        grid_spec=pltpu.PrefetchScalarGridSpec(
            num_scalar_prefetch=0,
            grid=(B, n_qt, n_kt),
            in_specs=[
                pl.BlockSpec((1, TQ, E), lambda b, qi, ki: (b, qi, 0)),        # q tile
                pl.BlockSpec((1, H, TK, dh), lambda b, qi, ki: (b, 0, ki, 0)),  # Kp tile
                pl.BlockSpec((1, H, TK, dh), lambda b, qi, ki: (b, 0, ki, 0)),  # Vp tile
                pl.BlockSpec((H, E, dh), lambda b, qi, ki: (0, 0, 0)),          # wq
                pl.BlockSpec((H, 1, dh), lambda b, qi, ki: (0, 0, 0)),          # bq
                pl.BlockSpec((H, dh, E), lambda b, qi, ki: (0, 0, 0)),          # wo
                pl.BlockSpec((1, E), lambda b, qi, ki: (0, 0)),                 # bo
                pl.BlockSpec((1, E), lambda b, qi, ki: (0, 0)),                 # ln gamma
                pl.BlockSpec((1, E), lambda b, qi, ki: (0, 0)),                 # ln beta
            ],
            out_specs=pl.BlockSpec((1, TQ, E), lambda b, qi, ki: (b, qi, 0)),
            scratch_shapes=[
                pltpu.VMEM((H, TQ, dh), cdt),           # projected Q (per q tile)
                pltpu.VMEM((H, TQ, 1), jnp.float32),    # running max
                pltpu.VMEM((H, TQ, 1), jnp.float32),    # running sum
                pltpu.VMEM((H, TQ, dh), jnp.float32),   # context accumulator
            ],
        ),
        compiler_params=pltpu.CompilerParams(
            dimension_semantics=("parallel", "parallel", "arbitrary"),
            vmem_limit_bytes=_vmem_limit(attn_est)),
        cost_estimate=pl.CostEstimate(
            flops=int(4 * B * Sq * E * E + 4 * B * Sq * Skv * E),
            transcendentals=int(B * H * Sq * Skv),
            bytes_accessed=int(itemsize * (2 * B * Sq * E
                                           + 2 * B * Skv * E * n_qt
                                           + 2 * E * E + 6 * E))),
    )(q, kp, vp, wq_h, bq_h, wo_h, bo, g1, b1)
    return out


# --------------------------------- pure-JAX reference ---------------------------------
def _reference(q, k, v, params, *, num_heads, add_skip, ln_eps=1e-5):
    B, Sq, E = q.shape
    H = num_heads
    dh = E // H
    qf, kf, vf = q.astype(jnp.float32), k.astype(jnp.float32), v.astype(jnp.float32)
    Qp = qf @ params["wq"].T + params["bq"]
    Kp = kf @ params["wk"].T + params["bk"]
    Vp = vf @ params["wv"].T + params["bv"]
    Qh = Qp.reshape(B, Sq, H, dh)
    Kh = Kp.reshape(B, -1, H, dh)
    Vh = Vp.reshape(B, -1, H, dh)
    scores = jnp.einsum('bqhd,bkhd->bhqk', Qh, Kh) / math.sqrt(dh)
    probs = jax.nn.softmax(scores, axis=-1)
    ctx = jnp.einsum('bhqk,bkhd->bqhd', probs, Vh).reshape(B, Sq, E)
    attn = ctx @ params["wo"].T + params["bo"]
    if add_skip:
        y = qf + attn
        mean = jnp.mean(y, axis=-1, keepdims=True)
        var = jnp.mean((y - mean) ** 2, axis=-1, keepdims=True)
        y = (y - mean) / jnp.sqrt(var + ln_eps)
        y = y * params["ln1_g"] + params["ln1_b"]
    else:
        y = attn
    return y.astype(q.dtype)


# -------------------------------- parameter construction -------------------------------
def make_params(key, embed_dim):
    E = embed_dim
    ks = jax.random.split(key, 8)
    s = 1.0 / math.sqrt(E)
    # nn.MultiheadAttention in_proj (split into q/k/v) + out_proj, PyTorch layout (out, in).
    return {
        "wq": jax.random.uniform(ks[0], (E, E), jnp.float32, -s, s),
        "wk": jax.random.uniform(ks[1], (E, E), jnp.float32, -s, s),
        "wv": jax.random.uniform(ks[2], (E, E), jnp.float32, -s, s),
        "wo": jax.random.uniform(ks[3], (E, E), jnp.float32, -s, s),
        "bq": jax.random.uniform(ks[4], (E,), jnp.float32, -s, s),
        "bk": jax.random.uniform(ks[5], (E,), jnp.float32, -s, s),
        "bv": jax.random.uniform(ks[6], (E,), jnp.float32, -s, s),
        "bo": jax.random.uniform(ks[7], (E,), jnp.float32, -s, s),
        # LayerNorm defaults: weight=1, bias=0
        "ln1_g": jnp.ones((E,), jnp.float32),
        "ln1_b": jnp.zeros((E,), jnp.float32),
    }
    # NOTE: linear_net / norm2 are defined in __init__ but unused in forward, so omitted.


if __name__ == "__main__":
    key = jax.random.PRNGKey(0)

    configs = [
        # (B, S, E, H, q_tile, kv_tile): tiny single-tile case + a tiled flash-loop case.
        (2, 8, 32, 4, 256, 512),
        (2, 256, 128, 4, 128, 128),
    ]
    ok = True
    for (B, S, E, H, qt, kt) in configs:
        kq, kk, kvv, kp, key = jax.random.split(key, 5)
        q = jax.random.normal(kq, (B, S, E), jnp.float32)
        k = jax.random.normal(kk, (B, S, E), jnp.float32)
        v = jax.random.normal(kvv, (B, S, E), jnp.float32)
        params = make_params(kp, E)
        for add_skip in (False, True):
            out = encoder_block_v3(q, k, v, params, num_heads=H, add_skip=add_skip,
                                   q_tile=qt, kv_tile=kt)
            out = jax.block_until_ready(out)
            ref = _reference(q, k, v, params, num_heads=H, add_skip=add_skip)
            # Tolerance loosened slightly for pl.reciprocal(approx=True) in the softmax.
            if not jnp.allclose(out, ref, atol=5e-3, rtol=5e-3):
                ok = False
                print(f"mismatch (S={S}, E={E}, add_skip={add_skip}): "
                      f"max abs err = {jnp.max(jnp.abs(out - ref))}")

    if ok:
        print("KERNEL_OK")
</pallas_src>

<mosaic_0001>
module attributes {stable_mosaic.version = 11 : i64} {
  func.func @_kv_proj_kernel(%arg0: i32, %arg1: i32, %arg2: memref<1x8x32xf32, #tpu.memory_space<vmem>>, %arg3: memref<1x8x32xf32, #tpu.memory_space<vmem>>, %arg4: memref<4x32x8xf32, #tpu.memory_space<vmem>>, %arg5: memref<4x1x8xf32, #tpu.memory_space<vmem>>, %arg6: memref<4x32x8xf32, #tpu.memory_space<vmem>>, %arg7: memref<4x1x8xf32, #tpu.memory_space<vmem>>, %arg8: memref<1x4x8x8xf32, #tpu.memory_space<vmem>>, %arg9: memref<1x4x8x8xf32, #tpu.memory_space<vmem>>) attributes {dimension_semantics = [#tpu.dimension_semantics<parallel>, #tpu.dimension_semantics<parallel>], iteration_bounds = array<i64: 2, 1>, scalar_prefetch = 0 : i64, scratch_operands = 0 : i64, tpu.core_type = #tpu.core_type<tc>, window_params = [{transform_indices = @transform_0, window_bounds = array<i64: 1, 8, 32>}, {transform_indices = @transform_1, window_bounds = array<i64: 1, 8, 32>}, {pipeline_mode = #tpu.pipeline_mode<synchronous>, transform_indices = @transform_2, window_bounds = array<i64: 4, 32, 8>}, {pipeline_mode = #tpu.pipeline_mode<synchronous>, transform_indices = @transform_3, window_bounds = array<i64: 4, 1, 8>}, {pipeline_mode = #tpu.pipeline_mode<synchronous>, transform_indices = @transform_4, window_bounds = array<i64: 4, 32, 8>}, {pipeline_mode = #tpu.pipeline_mode<synchronous>, transform_indices = @transform_5, window_bounds = array<i64: 4, 1, 8>}, {transform_indices = @transform_6, window_bounds = array<i64: 1, 4, 8, 8>}, {transform_indices = @transform_7, window_bounds = array<i64: 1, 4, 8, 8>}]} {
    %c0 = arith.constant 0 : index
    %c0_0 = arith.constant 0 : index
    %c0_1 = arith.constant 0 : index
    %0 = vector.load %arg2[%c0, %c0_0, %c0_1] : memref<1x8x32xf32, #tpu.memory_space<vmem>>, vector<1x8x32xf32>
    %1 = vector.shape_cast %0 : vector<1x8x32xf32> to vector<8x32xf32>
    %c0_2 = arith.constant 0 : index
    %c0_3 = arith.constant 0 : index
    %c0_4 = arith.constant 0 : index
    %2 = vector.load %arg3[%c0_2, %c0_3, %c0_4] : memref<1x8x32xf32, #tpu.memory_space<vmem>>, vector<1x8x32xf32>
    %3 = vector.shape_cast %2 : vector<1x8x32xf32> to vector<8x32xf32>
    %c0_5 = arith.constant 0 : index
    %c0_6 = arith.constant 0 : index
    %c0_7 = arith.constant 0 : index
    %4 = vector.load %arg4[%c0_5, %c0_6, %c0_7] : memref<4x32x8xf32, #tpu.memory_space<vmem>>, vector<1x32x8xf32>
    %5 = vector.shape_cast %4 : vector<1x32x8xf32> to vector<32x8xf32>
    %cst = arith.constant dense<0.000000e+00> : vector<8x8xf32>
    %6 = tpu.matmul %1, %5, %cst {dimension_numbers = #tpu.dot_dimension_numbers<[1], [0], [0], [1], [0, 0, 1, 1], [], []>} : vector<8x32xf32>, vector<32x8xf32>, vector<8x8xf32> -> vector<8x8xf32>
    %c0_8 = arith.constant 0 : index
    %c0_9 = arith.constant 0 : index
    %c0_10 = arith.constant 0 : index
    %7 = vector.load %arg5[%c0_8, %c0_9, %c0_10] : memref<4x1x8xf32, #tpu.memory_space<vmem>>, vector<1x1x8xf32>
    %8 = vector.shape_cast %7 : vector<1x1x8xf32> to vector<1x8xf32>
    %9 = vector.broadcast %8 : vector<1x8xf32> to vector<8x8xf32>
    %10 = arith.addf %6, %9 : vector<8x8xf32>
    %c0_11 = arith.constant 0 : index
    %c0_12 = arith.constant 0 : index
    %c0_13 = arith.constant 0 : index
    %c0_14 = arith.constant 0 : index
    %11 = vector.load %arg8[%c0_11, %c0_12, %c0_13, %c0_14] : memref<1x4x8x8xf32, #tpu.memory_space<vmem>>, vector<1x1x8x8xf32>
    %12 = vector.shape_cast %11 : vector<1x1x8x8xf32> to vector<8x8xf32>
    %13 = vector.shape_cast %10 : vector<8x8xf32> to vector<1x1x8x8xf32>
    tpu.vector_store %arg8[%c0_11, %c0_12, %c0_13, %c0_14], %13 {strides = array<i32>} : memref<1x4x8x8xf32, #tpu.memory_space<vmem>>, vector<1x1x8x8xf32>,
    %c0_15 = arith.constant 0 : index
    %c0_16 = arith.constant 0 : index
    %c0_17 = arith.constant 0 : index
    %14 = vector.load %arg6[%c0_15, %c0_16, %c0_17] : memref<4x32x8xf32, #tpu.memory_space<vmem>>, vector<1x32x8xf32>
    %15 = vector.shape_cast %14 : vector<1x32x8xf32> to vector<32x8xf32>
    %cst_18 = arith.constant dense<0.000000e+00> : vector<8x8xf32>
    %16 = tpu.matmul %3, %15, %cst_18 {dimension_numbers = #tpu.dot_dimension_numbers<[1], [0], [0], [1], [0, 0, 1, 1], [], []>} : vector<8x32xf32>, vector<32x8xf32>, vector<8x8xf32> -> vector<8x8xf32>
    %c0_19 = arith.constant 0 : index
    %c0_20 = arith.constant 0 : index
    %c0_21 = arith.constant 0 : index
    %17 = vector.load %arg7[%c0_19, %c0_20, %c0_21] : memref<4x1x8xf32, #tpu.memory_space<vmem>>, vector<1x1x8xf32>
    %18 = vector.shape_cast %17 : vector<1x1x8xf32> to vector<1x8xf32>
    %19 = vector.broadcast %18 : vector<1x8xf32> to vector<8x8xf32>
    %20 = arith.addf %16, %19 : vector<8x8xf32>
    %c0_22 = arith.constant 0 : index
    %c0_23 = arith.constant 0 : index
    %c0_24 = arith.constant 0 : index
    %c0_25 = arith.constant 0 : index
    %21 = vector.load %arg9[%c0_22, %c0_23, %c0_24, %c0_25] : memref<1x4x8x8xf32, #tpu.memory_space<vmem>>, vector<1x1x8x8xf32>
    %22 = vector.shape_cast %21 : vector<1x1x8x8xf32> to vector<8x8xf32>
    %23 = vector.shape_cast %20 : vector<8x8xf32> to vector<1x1x8x8xf32>
    tpu.vector_store %arg9[%c0_22, %c0_23, %c0_24, %c0_25], %23 {strides = array<i32>} : memref<1x4x8x8xf32, #tpu.memory_space<vmem>>, vector<1x1x8x8xf32>,
    %c1 = arith.constant 1 : index
    %c0_26 = arith.constant 0 : index
    %c0_27 = arith.constant 0 : index
    %24 = vector.load %arg4[%c1, %c0_26, %c0_27] : memref<4x32x8xf32, #tpu.memory_space<vmem>>, vector<1x32x8xf32>
    %25 = vector.shape_cast %24 : vector<1x32x8xf32> to vector<32x8xf32>
    %cst_28 = arith.constant dense<0.000000e+00> : vector<8x8xf32>
    %26 = tpu.matmul %1, %25, %cst_28 {dimension_numbers = #tpu.dot_dimension_numbers<[1], [0], [0], [1], [0, 0, 1, 1], [], []>} : vector<8x32xf32>, vector<32x8xf32>, vector<8x8xf32> -> vector<8x8xf32>
    %c1_29 = arith.constant 1 : index
    %c0_30 = arith.constant 0 : index
    %c0_31 = arith.constant 0 : index
    %27 = vector.load %arg5[%c1_29, %c0_30, %c0_31] : memref<4x1x8xf32, #tpu.memory_space<vmem>>, vector<1x1x8xf32>
    %28 = vector.shape_cast %27 : vector<1x1x8xf32> to vector<1x8xf32>
    %29 = vector.broadcast %28 : vector<1x8xf32> to vector<8x8xf32>
    %30 = arith.addf %26, %29 : vector<8x8xf32>
    %c0_32 = arith.constant 0 : index
    %c1_33 = arith.constant 1 : index
    %c0_34 = arith.constant 0 : index
    %c0_35 = arith.constant 0 : index
    %31 = vector.load %arg8[%c0_32, %c1_33, %c0_34, %c0_35] : memref<1x4x8x8xf32, #tpu.memory_space<vmem>>, vector<1x1x8x8xf32>
    %32 = vector.shape_cast %31 : vector<1x1x8x8xf32> to vector<8x8xf32>
    %33 = vector.shape_cast %30 : vector<8x8xf32> to vector<1x1x8x8xf32>
    tpu.vector_store %arg8[%c0_32, %c1_33, %c0_34, %c0_35], %33 {strides = array<i32>} : memref<1x4x8x8xf32, #tpu.memory_space<vmem>>, vector<1x1x8x8xf32>,
    %c1_36 = arith.constant 1 : index
    %c0_37 = arith.constant 0 : index
    %c0_38 = arith.constant 0 : index
    %34 = vector.load %arg6[%c1_36, %c0_37, %c0_38] : memref<4x32x8xf32, #tpu.memory_space<vmem>>, vector<1x32x8xf32>
    %35 = vector.shape_cast %34 : vector<1x32x8xf32> to vector<32x8xf32>
    %cst_39 = arith.constant dense<0.000000e+00> : vector<8x8xf32>
    %36 = tpu.matmul %3, %35, %cst_39 {dimension_numbers = #tpu.dot_dimension_numbers<[1], [0], [0], [1], [0, 0, 1, 1], [], []>} : vector<8x32xf32>, vector<32x8xf32>, vector<8x8xf32> -> vector<8x8xf32>
    %c1_40 = arith.constant 1 : index
    %c0_41 = arith.constant 0 : index
    %c0_42 = arith.constant 0 : index
    %37 = vector.load %arg7[%c1_40, %c0_41, %c0_42] : memref<4x1x8xf32, #tpu.memory_space<vmem>>, vector<1x1x8xf32>
    %38 = vector.shape_cast %37 : vector<1x1x8xf32> to vector<1x8xf32>
    %39 = vector.broadcast %38 : vector<1x8xf32> to vector<8x8xf32>
    %40 = arith.addf %36, %39 : vector<8x8xf32>
    %c0_43 = arith.constant 0 : index
    %c1_44 = arith.constant 1 : index
    %c0_45 = arith.constant 0 : index
    %c0_46 = arith.constant 0 : index
    %41 = vector.load %arg9[%c0_43, %c1_44, %c0_45, %c0_46] : memref<1x4x8x8xf32, #tpu.memory_space<vmem>>, vector<1x1x8x8xf32>
    %42 = vector.shape_cast %41 : vector<1x1x8x8xf32> to vector<8x8xf32>
    %43 = vector.shape_cast %40 : vector<8x8xf32> to vector<1x1x8x8xf32>
    tpu.vector_store %arg9[%c0_43, %c1_44, %c0_45, %c0_46], %43 {strides = array<i32>} : memref<1x4x8x8xf32, #tpu.memory_space<vmem>>, vector<1x1x8x8xf32>,
    %c2 = arith.constant 2 : index
    %c0_47 = arith.constant 0 : index
    %c0_48 = arith.constant 0 : index
    %44 = vector.load %arg4[%c2, %c0_47, %c0_48] : memref<4x32x8xf32, #tpu.memory_space<vmem>>, vector<1x32x8xf32>
    %45 = vector.shape_cast %44 : vector<1x32x8xf32> to vector<32x8xf32>
    %cst_49 = arith.constant dense<0.000000e+00> : vector<8x8xf32>
    %46 = tpu.matmul %1, %45, %cst_49 {dimension_numbers = #tpu.dot_dimension_numbers<[1], [0], [0], [1], [0, 0, 1, 1], [], []>} : vector<8x32xf32>, vector<32x8xf32>, vector<8x8xf32> -> vector<8x8xf32>
    %c2_50 = arith.constant 2 : index
    %c0_51 = arith.constant 0 : index
    %c0_52 = arith.constant 0 : index
    %47 = vector.load %arg5[%c2_50, %c0_51, %c0_52] : memref<4x1x8xf32, #tpu.memory_space<vmem>>, vector<1x1x8xf32>
    %48 = vector.shape_cast %47 : vector<1x1x8xf32> to vector<1x8xf32>
    %49 = vector.broadcast %48 : vector<1x8xf32> to vector<8x8xf32>
    %50 = arith.addf %46, %49 : vector<8x8xf32>
    %c0_53 = arith.constant 0 : index
    %c2_54 = arith.constant 2 : index
    %c0_55 = arith.constant 0 : index
    %c0_56 = arith.constant 0 : index
    %51 = vector.load %arg8[%c0_53, %c2_54, %c0_55, %c0_56] : memref<1x4x8x8xf32, #tpu.memory_space<vmem>>, vector<1x1x8x8xf32>
    %52 = vector.shape_cast %51 : vector<1x1x8x8xf32> to vector<8x8xf32>
    %53 = vector.shape_cast %50 : vector<8x8xf32> to vector<1x1x8x8xf32>
    tpu.vector_store %arg8[%c0_53, %c2_54, %c0_55, %c0_56], %53 {strides = array<i32>} : memref<1x4x8x8xf32, #tpu.memory_space<vmem>>, vector<1x1x8x8xf32>,
    %c2_57 = arith.constant 2 : index
    %c0_58 = arith.constant 0 : index
    %c0_59 = arith.constant 0 : index
    %54 = vector.load %arg6[%c2_57, %c0_58, %c0_59] : memref<4x32x8xf32, #tpu.memory_space<vmem>>, vector<1x32x8xf32>
    %55 = vector.shape_cast %54 : vector<1x32x8xf32> to vector<32x8xf32>
    %cst_60 = arith.constant dense<0.000000e+00> : vector<8x8xf32>
    %56 = tpu.matmul %3, %55, %cst_60 {dimension_numbers = #tpu.dot_dimension_numbers<[1], [0], [0], [1], [0, 0, 1, 1], [], []>} : vector<8x32xf32>, vector<32x8xf32>, vector<8x8xf32> -> vector<8x8xf32>
    %c2_61 = arith.constant 2 : index
    %c0_62 = arith.constant 0 : index
    %c0_63 = arith.constant 0 : index
    %57 = vector.load %arg7[%c2_61, %c0_62, %c0_63] : memref<4x1x8xf32, #tpu.memory_space<vmem>>, vector<1x1x8xf32>
    %58 = vector.shape_cast %57 : vector<1x1x8xf32> to vector<1x8xf32>
    %59 = vector.broadcast %58 : vector<1x8xf32> to vector<8x8xf32>
    %60 = arith.addf %56, %59 : vector<8x8xf32>
    %c0_64 = arith.constant 0 : index
    %c2_65 = arith.constant 2 : index
    %c0_66 = arith.constant 0 : index
    %c0_67 = arith.constant 0 : index
    %61 = vector.load %arg9[%c0_64, %c2_65, %c0_66, %c0_67] : memref<1x4x8x8xf32, #tpu.memory_space<vmem>>, vector<1x1x8x8xf32>
    %62 = vector.shape_cast %61 : vector<1x1x8x8xf32> to vector<8x8xf32>
    %63 = vector.shape_cast %60 : vector<8x8xf32> to vector<1x1x8x8xf32>
    tpu.vector_store %arg9[%c0_64, %c2_65, %c0_66, %c0_67], %63 {strides = array<i32>} : memref<1x4x8x8xf32, #tpu.memory_space<vmem>>, vector<1x1x8x8xf32>,
    %c3 = arith.constant 3 : index
    %c0_68 = arith.constant 0 : index
    %c0_69 = arith.constant 0 : index
    %64 = vector.load %arg4[%c3, %c0_68, %c0_69] : memref<4x32x8xf32, #tpu.memory_space<vmem>>, vector<1x32x8xf32>
    %65 = vector.shape_cast %64 : vector<1x32x8xf32> to vector<32x8xf32>
    %cst_70 = arith.constant dense<0.000000e+00> : vector<8x8xf32>
    %66 = tpu.matmul %1, %65, %cst_70 {dimension_numbers = #tpu.dot_dimension_numbers<[1], [0], [0], [1], [0, 0, 1, 1], [], []>} : vector<8x32xf32>, vector<32x8xf32>, vector<8x8xf32> -> vector<8x8xf32>
    %c3_71 = arith.constant 3 : index
    %c0_72 = arith.constant 0 : index
    %c0_73 = arith.constant 0 : index
    %67 = vector.load %arg5[%c3_71, %c0_72, %c0_73] : memref<4x1x8xf32, #tpu.memory_space<vmem>>, vector<1x1x8xf32>
    %68 = vector.shape_cast %67 : vector<1x1x8xf32> to vector<1x8xf32>
    %69 = vector.broadcast %68 : vector<1x8xf32> to vector<8x8xf32>
    %70 = arith.addf %66, %69 : vector<8x8xf32>
    %c0_74 = arith.constant 0 : index
    %c3_75 = arith.constant 3 : index
    %c0_76 = arith.constant 0 : index
    %c0_77 = arith.constant 0 : index
    %71 = vector.load %arg8[%c0_74, %c3_75, %c0_76, %c0_77] : memref<1x4x8x8xf32, #tpu.memory_space<vmem>>, vector<1x1x8x8xf32>
    %72 = vector.shape_cast %71 : vector<1x1x8x8xf32> to vector<8x8xf32>
    %73 = vector.shape_cast %70 : vector<8x8xf32> to vector<1x1x8x8xf32>
    tpu.vector_store %arg8[%c0_74, %c3_75, %c0_76, %c0_77], %73 {strides = array<i32>} : memref<1x4x8x8xf32, #tpu.memory_space<vmem>>, vector<1x1x8x8xf32>,
    %c3_78 = arith.constant 3 : index
    %c0_79 = arith.constant 0 : index
    %c0_80 = arith.constant 0 : index
    %74 = vector.load %arg6[%c3_78, %c0_79, %c0_80] : memref<4x32x8xf32, #tpu.memory_space<vmem>>, vector<1x32x8xf32>
    %75 = vector.shape_cast %74 : vector<1x32x8xf32> to vector<32x8xf32>
    %cst_81 = arith.constant dense<0.000000e+00> : vector<8x8xf32>
    %76 = tpu.matmul %3, %75, %cst_81 {dimension_numbers = #tpu.dot_dimension_numbers<[1], [0], [0], [1], [0, 0, 1, 1], [], []>} : vector<8x32xf32>, vector<32x8xf32>, vector<8x8xf32> -> vector<8x8xf32>
    %c3_82 = arith.constant 3 : index
    %c0_83 = arith.constant 0 : index
    %c0_84 = arith.constant 0 : index
    %77 = vector.load %arg7[%c3_82, %c0_83, %c0_84] : memref<4x1x8xf32, #tpu.memory_space<vmem>>, vector<1x1x8xf32>
    %78 = vector.shape_cast %77 : vector<1x1x8xf32> to vector<1x8xf32>
    %79 = vector.broadcast %78 : vector<1x8xf32> to vector<8x8xf32>
    %80 = arith.addf %76, %79 : vector<8x8xf32>
    %c0_85 = arith.constant 0 : index
    %c3_86 = arith.constant 3 : index
    %c0_87 = arith.constant 0 : index
    %c0_88 = arith.constant 0 : index
    %81 = vector.load %arg9[%c0_85, %c3_86, %c0_87, %c0_88] : memref<1x4x8x8xf32, #tpu.memory_space<vmem>>, vector<1x1x8x8xf32>
    %82 = vector.shape_cast %81 : vector<1x1x8x8xf32> to vector<8x8xf32>
    %83 = vector.shape_cast %80 : vector<8x8xf32> to vector<1x1x8x8xf32>
    tpu.vector_store %arg9[%c0_85, %c3_86, %c0_87, %c0_88], %83 {strides = array<i32>} : memref<1x4x8x8xf32, #tpu.memory_space<vmem>>, vector<1x1x8x8xf32>,
    return
  }
  func.func @transform_0(%arg0: i32, %arg1: i32) -> (i32, i32, i32) {
    %c0_i32 = arith.constant 0 : i32
    %c0_i32_0 = arith.constant 0 : i32
    return %arg0, %arg1, %c0_i32 : i32, i32, i32
  }
  func.func @transform_1(%arg0: i32, %arg1: i32) -> (i32, i32, i32) {
    %c0_i32 = arith.constant 0 : i32
    %c0_i32_0 = arith.constant 0 : i32
    return %arg0, %arg1, %c0_i32 : i32, i32, i32
  }
  func.func @transform_2(%arg0: i32, %arg1: i32) -> (i32, i32, i32) {
    %c0_i32 = arith.constant 0 : i32
    %c0_i32_0 = arith.constant 0 : i32
    %c0_i32_1 = arith.constant 0 : i32
    %c0_i32_2 = arith.constant 0 : i32
    return %c0_i32, %c0_i32_0, %c0_i32_1 : i32, i32, i32
  }
  func.func @transform_3(%arg0: i32, %arg1: i32) -> (i32, i32, i32) {
    %c0_i32 = arith.constant 0 : i32
    %c0_i32_0 = arith.constant 0 : i32
    %c0_i32_1 = arith.constant 0 : i32
    %c0_i32_2 = arith.constant 0 : i32
    return %c0_i32, %c0_i32_0, %c0_i32_1 : i32, i32, i32
  }
  func.func @transform_4(%arg0: i32, %arg1: i32) -> (i32, i32, i32) {
    %c0_i32 = arith.constant 0 : i32
    %c0_i32_0 = arith.constant 0 : i32
    %c0_i32_1 = arith.constant 0 : i32
    %c0_i32_2 = arith.constant 0 : i32
    return %c0_i32, %c0_i32_0, %c0_i32_1 : i32, i32, i32
  }
  func.func @transform_5(%arg0: i32, %arg1: i32) -> (i32, i32, i32) {
    %c0_i32 = arith.constant 0 : i32
    %c0_i32_0 = arith.constant 0 : i32
    %c0_i32_1 = arith.constant 0 : i32
    %c0_i32_2 = arith.constant 0 : i32
    return %c0_i32, %c0_i32_0, %c0_i32_1 : i32, i32, i32
  }
  func.func @transform_6(%arg0: i32, %arg1: i32) -> (i32, i32, i32, i32) {
    %c0_i32 = arith.constant 0 : i32
    %c0_i32_0 = arith.constant 0 : i32
    %c0_i32_1 = arith.constant 0 : i32
    return %arg0, %c0_i32, %arg1, %c0_i32_0 : i32, i32, i32, i32
  }
  func.func @transform_7(%arg0: i32, %arg1: i32) -> (i32, i32, i32, i32) {
    %c0_i32 = arith.constant 0 : i32
    %c0_i32_0 = arith.constant 0 : i32
    %c0_i32_1 = arith.constant 0 : i32
    return %arg0, %c0_i32, %arg1, %c0_i32_0 : i32, i32, i32, i32
  }
}

</mosaic_0001>

<bundles_post_ra>
// kernel: tpu_custom_call.1
= control target key start
LH: loop header
LB: loop body
LE: loop exit
PB: predicated region body
PF: predicated region fallthrough
CT: control target
= control target key end

     0   :  { %s2008_s0 = inlined_call_operand.vmem [shape: f32[2,8,32], index: 0, kind: input, shape index: {}]   ;;  %s2009_s1 = inlined_call_operand.vmem [shape: f32[2,8,32], index: 1, kind: input, shape index: {}]   ;;  %s2010_s2 = inlined_call_operand.vmem [shape: f32[4,32,8], index: 2, kind: input, shape index: {}]   ;;  %s2011_s3 = inlined_call_operand.vmem [shape: f32[4,1,8], index: 3, kind: input, shape index: {}]   ;;  %s2012_s4 = inlined_call_operand.vmem [shape: f32[4,32,8], index: 4, kind: input, shape index: {}]   ;;  %s2013_s5 = inlined_call_operand.vmem [shape: f32[4,1,8], index: 5, kind: input, shape index: {}]   ;;  %s2014_s6 = inlined_call_operand.hbm [shape: f32[2,4,8,8], index: 6, kind: output, shape index: {0}]   ;;  %s2015_s7 = inlined_call_operand.hbm [shape: f32[2,4,8,8], index: 7, kind: output, shape index: {1}]  }
   0x1   :  { %2016 = sst [smem:[#allocation8_spill]] %s2008_s0 }
   0x2   :  { %13 = vsyncpa [#allocation3], 0 }
   0x3   :  { %15 = vsyncpa [#allocation3 + $0x1], 0 }
   0x4   :  { %16 = vsyncpa [#allocation5], 0 }
   0x5   :  { %18 = vsyncpa [#allocation5 + $0x1], 0  ;;  %s1656_s24 = smov 0   ;;  %s1658_s25 = smov 0  }
   0x6   :  { %s1660_s26 = smov 0   ;;  %s1662_s27 = smov 0  }
   0x7   :  { %s1664_s28 = smov 0   ;;  %s1666_s29 = smov 0  }
   0x8 LB: > { %s1185_s30 = sadd.s32 4294967295, %s1607_s29   ;;  %s1186_s8 = sadd.s32 4294967294, %s1607_s29   ;;  %s1607_s29 = sphi %s1666_s29, %s24_s29   ;;  %s1603_s28 = sphi %s1664_s28, %s2024_s28   ;;  %s1599_s27 = sphi %s1662_s27, %s2023_s27   ;;  %s1595_s26 = sphi %s1660_s26, %s2022_s26   ;;  %s1591_s25 = sphi %s1658_s25, %s2021_s25   ;;  %s1587_s24 = sphi %s1656_s24, %s2020_s24  }
   0x9   : > { %s36_s9 = sadd.s32 1, %s1603_s28  ;;  %s185_s10 = sadd.s32 1, %s1595_s26 }
   0xa   : > { %p38_p0 = scmp.ge.s32.totalorder %s36_s9, 2  ;;  %p195_p1 = scmp.ne.s32.totalorder %s1595_s26, %s1591_s25 }
   0xb   : > { %p196_p2 = scmp.eq.s32.totalorder %s1185_s30, 1  ;;  %p201_p3 = scmp.ne.s32.totalorder %s1591_s25, %s1587_s24 }
   0xc   : > { %s2026_s9 = smov (%p38_p0, %s36_s9), 0  ;;  %p202_p5 = scmp.eq.s32.totalorder %s1186_s8, 1 }
   0xd   : > { %p1696_p4 = por %p196_p2, %p195_p1  ;;  %s180_s12 = ssub.s32 %s1603_s28, %s2026_s9 }
   0xe   : > { %p1189_p6 = scmp.ge.s32.totalorder %s1607_s29, 1  ;;  %p183_p7 = scmp.eq.s32.totalorder %s180_s12, 0 }
   0xf   : > { %p1703_p8 = por %p202_p5, %p201_p3  ;;  %p280_p9 = scmp.lt.s32.totalorder %s1607_s29, 3 }
  0x10   : > { %s1709_s14 = scalar_select %p183_p7, %s1595_s26, %s185_s10  }
  0x11   : > { %p281_p10 = pnand %p1189_p6, %p280_p9 }
  0x12   : > { %v342_v0 = vld [vmem:[%s2010_s2] sm:$0xff] (!%p281_p10)  ;;  %v343_v1 = vld [vmem:[%s2010_s2 + $0x8] sm:$0xff] (!%p281_p10)  ;;  %v1609_v3 = vmov (!%p281_p10), 0.0|0.0   ;;  %v344_v6 = vld [vmem:[%s2010_s2 + $0x10] sm:$0xff] (!%p281_p10)  ;;  %p326_p11 = scmp.lt.s32.totalorder (!%p281_p10), %s1599_s27, 1  ;;  %vm1610_vm0 = vmmov (!%p281_p10), 0  }
  0x13   : > { %284 = sbr.rel (%p281_p10) target bundleno = 308 (0x134), region = 44  ;;  %v429_v2 = vld [vmem:[%s2012_s4] sm:$0xff] (!%p281_p10)  ;;  %1384 = vmatprep.subr.bf16.mxu0 (!%p281_p10), %v1609_v3  ;;  %1390 = vmatprep.subr.bf16.mxu1 (!%p281_p10), %v1609_v3  ;;  %v1385_v4 = vpack.c.bf16 (!%p281_p10), %v343_v1, %v342_v0  ;;  %v430_v5 = vld [vmem:[%s2012_s4 + $0x8] sm:$0xff] (!%p281_p10)  ;;  %v345_v7 = vld [vmem:[%s2010_s2 + $0x18] sm:$0xff] (!%p281_p10)  ;;  %v1611_v11 = vmov (!%p281_p10), 0.0   ;;  %s2019_s0 = sld [smem:[#allocation8_spill]] (!%p281_p10) }
  0x14   : > { %v1391_v8 = vpack.c.bf16 (!%p281_p10), %v430_v5, %v429_v2  ;;  %v431_v9 = vld [vmem:[%s2012_s4 + $0x10] sm:$0xff] (!%p281_p10)  ;;  %v432_v10 = vld [vmem:[%s2012_s4 + $0x18] sm:$0xff] (!%p281_p10)  ;;  %1304 = vmatprep.mubr.msk.f32.mxu0 (!%p281_p10), %vm1610_vm0, %v1611_v11  ;;  %1315 = vmatprep.mubr.msk.f32.mxu1 (!%p281_p10), %vm1610_vm0, %v1611_v11  ;;  %v1388_v12 = vpack.c.bf16 (!%p281_p10), %v345_v7, %v344_v6  ;;  %v1198_v14 = vld [vmem:[%s2010_s2 + $0x20] sm:$0xff] (!%p281_p10)  ;;  %vm353_vm1 = vcmask (!%p281_p10), 261120   ;;  %s1868_s22 = sand.u32 (!%p281_p10), 1, %s1591_s25   ;;  %vm427_vm2 = vcmask (!%p281_p10), 64512  }
  0x15   : > { %1386 = vmatpush3.bf16.msra.mxu0 (!%p281_p10), %v1385_v4  ;;  %v1394_v13 = vpack.c.bf16 (!%p281_p10), %v432_v10, %v431_v9  ;;  %v1199_v15 = vld [vmem:[%s2010_s2 + $0x28] sm:$0xff] (!%p281_p10)  ;;  %v1206_v16 = vld [vmem:[%s2012_s4 + $0x20] sm:$0xff] (!%p281_p10)  ;;  %v1200_v22 = vld [vmem:[%s2010_s2 + $0x30] sm:$0xff] (!%p281_p10)  ;;  %s1190_s30 = sshll.u32 (!%p281_p10), %s1868_s22, 5  ;;  %s1254_s12 = sshll.u32 (!%p281_p10), %s1599_s27, 9 }
  0x16   : > { %1392 = vmatpush3.bf16.msra.mxu1 (!%p281_p10), %v1391_v8  ;;  %1387 = vmatprep.subr.bf16.mxu0 (!%p281_p10), %v1609_v3  ;;  %v1207_v17 = vld [vmem:[%s2012_s4 + $0x28] sm:$0xff] (!%p281_p10)  ;;  %v1397_v19 = vpack.c.bf16 (!%p281_p10), %v1199_v15, %v1198_v14  ;;  %v1201_v23 = vld [vmem:[%s2010_s2 + $0x38] sm:$0xff] (!%p281_p10)  ;;  %v1208_v24 = vld [vmem:[%s2012_s4 + $0x30] sm:$0xff] (!%p281_p10)  ;;  %s1877_s15 = scalar_lea.vmem (!%p281_p10), [#allocation2], %s1190_s30  ;;  %s1881_s16 = scalar_lea.vmem (!%p281_p10), [#allocation4], %s1190_s30 }
  0x17   : > { %1393 = vmatprep.subr.bf16.mxu1 (!%p281_p10), %v1609_v3  ;;  %v1403_v21 = vpack.c.bf16 (!%p281_p10), %v1207_v17, %v1206_v16  ;;  %v1209_v25 = vld [vmem:[%s2012_s4 + $0x38] sm:$0xff] (!%p281_p10)  ;;  %v1400_v26 = vpack.c.bf16 (!%p281_p10), %v1201_v23, %v1200_v22  ;;  %v1214_v28 = vld [vmem:[%s2010_s2 + $0x40] sm:$0xff] (!%p281_p10)  ;;  %v1215_v29 = vld [vmem:[%s2010_s2 + $0x48] sm:$0xff] (!%p281_p10)  ;;  %s1044_s10 = sshll.u32 (!%p281_p10), %s1877_s15, 4  ;;  %s1061_s20 = sshll.u32 (!%p281_p10), %s1881_s16, 4  ;;  %s1914_s10 = int_to_ptr.vmem [resolvable:$true] %s1044_s10  ;;  %s1921_s20 = int_to_ptr.vmem [resolvable:$true] %s1061_s20 }
  0x18   : > { %v1406_v27 = vpack.c.bf16 (!%p281_p10), %v1209_v25, %v1208_v24  ;;  %v1222_v30 = vld [vmem:[%s2012_s4 + $0x40] sm:$0xff] (!%p281_p10)  ;;  %v1223_v31 = vld [vmem:[%s2012_s4 + $0x48] sm:$0xff] (!%p281_p10)  ;;  %v1409_v32 = vpack.c.bf16 (!%p281_p10), %v1215_v29, %v1214_v28  ;;  %v1216_v34 = vld [vmem:[%s2010_s2 + $0x50] sm:$0xff] (!%p281_p10)  ;;  %s1926_s19 = scalar_lea.hbm (!%p281_p10), %s2015_s7, %s1254_s12  ;;  %s1612_s30 = smov (!%p281_p10), [#allocation2]  }
  0x19   : > { %1389 = vmatpush3.bf16.msra.mxu0 (!%p281_p10), %v1388_v12  ;;  %v1415_v33 = vpack.c.bf16 (!%p281_p10), %v1223_v31, %v1222_v30  ;;  %v1217_v35 = vld [vmem:[%s2010_s2 + $0x58] sm:$0xff] (!%p281_p10)  ;;  %v1224_v36 = vld [vmem:[%s2012_s4 + $0x50] sm:$0xff] (!%p281_p10)  ;;  %v1230_v40 = vld [vmem:[%s2010_s2 + $0x60] sm:$0xff] (!%p281_p10)  ;;  %s1501_s8 = sshll.u32 (!%p281_p10), %s1612_s30, 4  ;;  %s1502_s8 = int_to_ptr.vmem [resolvable:$false] %s1501_s8 }
  0x1a   : > { %s327_s18 = scalar_select %p326_p11, %s1599_s27, 1  ;;  %1395 = vmatpush3.bf16.msra.mxu1 %v1394_v13  ;;  %1396 = vmatprep.subr.bf16.mxu0 %v1609_v3  ;;  %v1225_v37 = vld [vmem:[%s2012_s4 + $0x58] sm:$0xff]  ;;  %v1412_v38 = vpack.c.bf16 %v1217_v35, %v1216_v34  ;;  %v1231_v41 = vld [vmem:[%s2010_s2 + $0x68] sm:$0xff]  ;;  %v1238_v42 = vld [vmem:[%s2012_s4 + $0x60] sm:$0xff] }
  0x1b   : > { %1402 = vmatprep.subr.bf16.mxu1 %v1609_v3  ;;  %v1418_v39 = vpack.c.bf16 %v1225_v37, %v1224_v36  ;;  %v1239_v43 = vld [vmem:[%s2012_s4 + $0x68] sm:$0xff]  ;;  %v1421_v44 = vpack.c.bf16 %v1231_v41, %v1230_v40  ;;  %v1232_v46 = vld [vmem:[%s2010_s2 + $0x70] sm:$0xff]  ;;  %v1233_v47 = vld [vmem:[%s2010_s2 + $0x78] sm:$0xff]  ;;  %s1919_s27 = scalar_lea.hbm %s2014_s6, %s1254_s12  ;;  %p1504_p1 = scmp.lt.s32.totalorder %s1914_s10, %s1502_s8 }
  0x1c   : > { %s1192_s23 = sshll.u32 %s327_s18, 3  ;;  %v1427_v45 = vpack.c.bf16 %v1239_v43, %v1238_v42  ;;  %v1240_v48 = vld [vmem:[%s2012_s4 + $0x70] sm:$0xff]  ;;  %v1241_v49 = vld [vmem:[%s2012_s4 + $0x78] sm:$0xff]  ;;  %v1424_v50 = vpack.c.bf16 %v1233_v47, %v1232_v46  ;;  %v1194_v52 = vld [vmem:[%s2011_s3] ss:$0 sm:$0xff]  ;;  %s1497_s18 = scalar_lea.vmem %s1914_s10, 512 }
  0x1d   : > { %s332_s17 = scalar_lea.vmem %s2019_s0, %s1192_s23  ;;  %s339_s21 = scalar_lea.vmem %s2009_s1, %s1192_s23  ;;  %v1430_v51 = vpack.c.bf16 %v1241_v49, %v1240_v48  ;;  %v1196_v53 = vld [vmem:[%s2013_s5] ss:$0 sm:$0xff]  ;;  %v1203_v60 = vld [vmem:[%s2011_s3 + $0x1] ss:$0 sm:$0xff]  ;;  %v1219_v4 = vld [vmem:[%s2011_s3 + $0x2] ss:$0 sm:$0xff] }
  0x1e   : > { %v1763_v18 = vld [vmem:[%s332_s17] sm:$0xff]  ;;  %p1498_p12 = scmp.ne.s32.totalorder %s1914_s10, %s1497_s18  ;;  %s1503_s0 = scalar_lea.vmem %s1502_s8, 1024 }
  0x1f   : > { %v1765_v20 = vld [vmem:[%s339_s21] sm:$0xff]  ;;  %1305 = vmatmul.mubr.msk.f32.vlgmr.msra.gmra.mrb[0].mxu0 %vm353_vm1, %v1763_v18  ;;  %s1025_s21 = scalar_lea.sflag [#allocation3], %s1868_s22  ;;  %p1505_p2 = scmp.lt.s32.totalorder %s1503_s0, %s1497_s18 }
  0x20   : > { %1316 = vmatmul.mubr.msk.f32.vlgmr.msra.gmra.mrb[0].mxu1 %vm353_vm1, %v1765_v20  ;;  %1398 = vmatpush3.bf16.msra.mxu0 %v1397_v19  ;;  %v1211_v61 = vld [vmem:[%s2013_s5 + $0x1] ss:$0 sm:$0xff]  ;;  %v1227_v5 = vld [vmem:[%s2013_s5 + $0x2] ss:$0 sm:$0xff]  ;;  %v1235_v12 = vld [vmem:[%s2011_s3 + $0x3] ss:$0 sm:$0xff]  ;;  %p1499_p13 = pnand %p1498_p12, %p1696_p4 }
  0x21   : > { %1404 = vmatpush3.bf16.msra.mxu1 %v1403_v21  ;;  %1399 = vmatprep.subr.bf16.mxu0 %v1609_v3  ;;  %v1243_v13 = vld [vmem:[%s2013_s5 + $0x3] ss:$0 sm:$0xff]  ;;  %p1506_p3 = por %p1505_p2, %p1504_p1 }
  0x22   : > { %1405 = vmatprep.subr.bf16.mxu1 %v1609_v3  ;;  %1326 = vmatprep.mubr.msk.f32.mxu0 %vm1610_vm0, %v1611_v11  ;;  %p1500_p0 = pneg %p1499_p13 }
  0x23   : > { %1337 = vmatprep.mubr.msk.f32.mxu1 %vm1610_vm0, %v1611_v11 }
  0x24   : > { %1401 = vmatpush3.bf16.msra.mxu0 %v1400_v26  ;;  %p1507_p5 = pnand %p1506_p3, %p1500_p0 }
  0x25   : > { %1407 = vmatpush3.bf16.msra.mxu1 %v1406_v27  ;;  %1408 = vmatprep.subr.bf16.mxu0 %v1609_v3 }
  0x26   : > { %1414 = vmatprep.subr.bf16.mxu1 %v1609_v3 }
  0x27   : > { %1327 = vmatmul.mubr.msk.f32.vlgmr.msra.gmra.mrb[2].mxu0 %vm353_vm1, %v1763_v18 }
  0x28   : > { %1338 = vmatmul.mubr.msk.f32.vlgmr.msra.gmra.mrb[2].mxu1 %vm353_vm1, %v1765_v20  ;;  %1410 = vmatpush3.bf16.msra.mxu0 %v1409_v32 }
  0x29   : > { %1416 = vmatpush3.bf16.msra.mxu1 %v1415_v33  ;;  %1411 = vmatprep.subr.bf16.mxu0 %v1609_v3 }
  0x2a   : > { %1417 = vmatprep.subr.bf16.mxu1 %v1609_v3  ;;  %1348 = vmatprep.mubr.msk.f32.mxu0 %vm1610_vm0, %v1611_v11 }
  0x2b   : > { %1359 = vmatprep.mubr.msk.f32.mxu1 %vm1610_vm0, %v1611_v11 }
  0x2c   : > { %1413 = vmatpush3.bf16.msra.mxu0 %v1412_v38 }
  0x2d   : > { %1419 = vmatpush3.bf16.msra.mxu1 %v1418_v39  ;;  %1420 = vmatprep.subr.bf16.mxu0 %v1609_v3 }
  0x2e   : > { %1426 = vmatprep.subr.bf16.mxu1 %v1609_v3 }
  0x2f   : > { %1349 = vmatmul.mubr.msk.f32.vlgmr.msra.gmra.mrb[4].mxu0 %vm353_vm1, %v1763_v18 }
  0x30   : > { %1360 = vmatmul.mubr.msk.f32.vlgmr.msra.gmra.mrb[4].mxu1 %vm353_vm1, %v1765_v20  ;;  %1422 = vmatpush3.bf16.msra.mxu0 %v1421_v44 }
  0x31   : > { %1428 = vmatpush3.bf16.msra.mxu1 %v1427_v45  ;;  %1423 = vmatprep.subr.bf16.mxu0 %v1609_v3 }
  0x32   : > { %1429 = vmatprep.subr.bf16.mxu1 %v1609_v3  ;;  %1370 = vmatprep.mubr.msk.f32.mxu0 %vm1610_vm0, %v1611_v11 }
  0x33   : > { %1381 = vmatprep.mubr.msk.f32.mxu1 %vm1610_vm0, %v1611_v11 }
  0x34   : > { %1425 = vmatpush3.bf16.msra.mxu0 %v1424_v50 }
  0x35   : > { %1431 = vmatpush3.bf16.msra.mxu1 %v1430_v51 }
  0x37   : > { %1371 = vmatmul.mubr.msk.f32.vlgmr.msra.gmra.mrb[6].mxu0 %vm353_vm1, %v1763_v18 }
  0x38   : > { %1382 = vmatmul.mubr.msk.f32.vlgmr.msra.gmra.mrb[6].mxu1 %vm353_vm1, %v1765_v20 }
  0xf2   : > { %v423_v54 = vpop.f32.mrb[0].mxu0 }
  0xf3   : > { %v424_v55 = vadd.f32 %v1194_v52, %v423_v54  ;;  %v509_v56 = vpop.f32.mrb[0].mxu1  ;;  %v1306_v57 = vpop.f32.mrb[1].mxu0 }
  0xf4   : > { %v510_v58 = vadd.f32 %v1196_v53, %v509_v56  ;;  %v1317_v59 = vpop.f32.mrb[1].mxu1 }
  0xf5   : > { %428 = vst.msk [vmem:[%s1877_s15] sm:$0xff] %vm427_vm2, %v424_v55 }
  0xf6   : > { %513 = vst.msk [vmem:[%s1881_s16] sm:$0xff] %vm427_vm2, %v510_v58 }
  0xfa   : > { %v593_v62 = vpop.f32.mrb[2].mxu0 }
  0xfb   : > { %v594_v63 = vadd.f32 %v1203_v60, %v593_v62  ;;  %v678_v0 = vpop.f32.mrb[2].mxu1  ;;  %v1328_v1 = vpop.f32.mrb[3].mxu0 }
  0xfc   : > { %v679_v2 = vadd.f32 %v1211_v61, %v678_v0  ;;  %v1339_v3 = vpop.f32.mrb[3].mxu1 }
  0xfd   : > { %1205 = vst.msk [vmem:[%s1877_s15 + $0x8] sm:$0xff] %vm427_vm2, %v594_v63 }
  0xfe   : > { %1213 = vst.msk [vmem:[%s1881_s16 + $0x8] sm:$0xff] %vm427_vm2, %v679_v2 }
 0x102   : > { %v763_v6 = vpop.f32.mrb[4].mxu0 }
 0x103   : > { %v764_v7 = vadd.f32 %v1219_v4, %v763_v6  ;;  %v848_v8 = vpop.f32.mrb[4].mxu1  ;;  %v1350_v9 = vpop.f32.mrb[5].mxu0 }
 0x104   : > { %v849_v10 = vadd.f32 %v1227_v5, %v848_v8  ;;  %v1361_v11 = vpop.f32.mrb[5].mxu1 }
 0x105   : > { %1221 = vst.msk [vmem:[%s1877_s15 + $0x10] sm:$0xff] %vm427_vm2, %v764_v7 }
 0x106   : > { %1229 = vst.msk [vmem:[%s1881_s16 + $0x10] sm:$0xff] %vm427_vm2, %v849_v10 }
 0x10a   : > { %v933_v14 = vpop.f32.mrb[6].mxu0 }
 0x10b   : > { %v934_v15 = vadd.f32 %v1235_v12, %v933_v14  ;;  %v1018_v16 = vpop.f32.mrb[6].mxu1  ;;  %v1372_v17 = vpop.f32.mrb[7].mxu0 }
 0x10c   : > { %v1019_v18 = vadd.f32 %v1243_v13, %v1018_v16  ;;  %v1383_v19 = vpop.f32.mrb[7].mxu1 }
 0x10d   : > { %1237 = vst.msk [vmem:[%s1877_s15 + $0x18] sm:$0xff] %vm427_vm2, %v934_v15 }
 0x10e   : > { %1245 = vst.msk [vmem:[%s1881_s16 + $0x18] sm:$0xff] %vm427_vm2, %v1019_v18 }
 0x10f   : > { %1510 = shalt.err (!%p1507_p5)
}
 0x110   : > { %s1511_s15 = scalar_lea.hbm %s1919_s27, 512  ;;  %s1515_s23 = scalar_lea.hbm %s2014_s6, 1024 }
 0x111   : > { %p1512_p6 = scmp.ne.s32.totalorder %s1919_s27, %s1511_s15  ;;  %p1516_p10 = scmp.lt.u32.totalorder %s1919_s27, %s2014_s6 }
 0x112   : > { %p1517_p11 = scmp.lt.u32.totalorder %s1515_s23, %s1511_s15  ;;  %p1519_p13 = scmp.lt.u32.totalorder %s1511_s15, %s1919_s27 }
 0x113   : > { %p1513_p7 = pnand %p1512_p6, %p1696_p4 }
 0x114   : > { %p1518_p12 = por %p1517_p11, %p1516_p10 }
 0x115   : > { %p1514_p9 = pneg %p1513_p7 }
 0x116   : > { %p1520_p0 = por %p1519_p13, %p1518_p12 }
 0x118   : > { %p1521_p1 = pnand %p1520_p0, %p1514_p9 }
 0x11a   : > { %1524 = shalt.err (!%p1521_p1)
}
 0x11b   : > { %s1613_s0 = smov 128   ;;  %s1614_s18 = smov 8  }
 0x11c   : > { %1432 = dma.vmem_to_hbm [thread:$0]  (%p1696_p4), %s1914_s10, 512, %s1919_s27, %s1025_s21, %s1613_s0, %s1613_s0, %s1614_s18  }
 0x11d   : > { %s1030_s8 = scalar_lea.sflag [#allocation5], %s1868_s22  ;;  %s1525_s15 = scalar_lea.vmem %s1921_s20, 512 }
 0x11e   : > { %p1526_p2 = scmp.ne.s32.totalorder %s1921_s20, %s1525_s15  ;;  %s1615_s16 = smov [#allocation4]  }
 0x11f   : > { %s1529_s12 = sshll.u32 %s1615_s16, 4  ;;  %s1530_s12 = int_to_ptr.vmem [resolvable:$false] %s1529_s12 }
 0x120   : > { %p1527_p3 = pnand %p1526_p2, %p1696_p4  ;;  %s1531_s23 = scalar_lea.vmem %s1530_s12, 1024 }
 0x121   : > { %p1532_p6 = scmp.lt.s32.totalorder %s1921_s20, %s1530_s12  ;;  %p1533_p7 = scmp.lt.s32.totalorder %s1531_s23, %s1525_s15 }
 0x122   : > { %p1528_p5 = pneg %p1527_p3 }
 0x123   : > { %p1534_p9 = por %p1533_p7, %p1532_p6 }
 0x125   : > { %p1535_p10 = pnand %p1534_p9, %p1528_p5 }
 0x127   : > { %1538 = shalt.err (!%p1535_p10)
}
 0x128   : > { %s1539_s10 = scalar_lea.hbm %s1926_s19, 512  ;;  %s1543_s17 = scalar_lea.hbm %s2015_s7, 1024 }
 0x129   : > { %p1540_p11 = scmp.ne.s32.totalorder %s1926_s19, %s1539_s10  ;;  %p1544_p0 = scmp.lt.u32.totalorder %s1926_s19, %s2015_s7 }
 0x12a   : > { %p1545_p1 = scmp.lt.u32.totalorder %s1543_s17, %s1539_s10  ;;  %p1547_p3 = scmp.lt.u32.totalorder %s1539_s10, %s1926_s19 }
 0x12b   : > { %p1541_p12 = pnand %p1540_p11, %p1696_p4 }
 0x12c   : > { %p1546_p2 = por %p1545_p1, %p1544_p0 }
 0x12d   : > { %p1542_p13 = pneg %p1541_p12 }
 0x12e   : > { %p1548_p5 = por %p1547_p3, %p1546_p2 }
 0x130   : > { %p1549_p6 = pnand %p1548_p5, %p1542_p13 }
 0x132   : > { %1552 = shalt.err (!%p1549_p6)
}
 0x133   : > { %1433 = dma.vmem_to_hbm [thread:$0]  (%p1696_p4), %s1921_s20, 512, %s1926_s19, %s1030_s8, %s1613_s0, %s1613_s0, %s1614_s18  }
 0x134 PF: > { %p1443_p7 = scmp.ge.s32.totalorder %s1607_s29, 2  ;;  %s1076_s15 = sand.u32 1, %s1587_s24  }
 0x135   : > { %s1077_s12 = scalar_lea.sflag [#allocation3], %s1076_s15 }
 0x136   : > { %p1437_p9 = pnand %p1443_p7, %p1703_p8 }
 0x138   : > { %1578 = dma.done.wait (!%p1437_p9), %s1077_s12, 512  }
 0x139   : > { %1580 = vsyncadd (!%p1437_p9), %s1077_s12, 4294966784  ;;  %s1086_s11 = scalar_lea.sflag [#allocation5], %s1076_s15 }
 0x13a   : > { %1582 = dma.done.wait (!%p1437_p9), %s1086_s11, 512  }
 0x13b   : > { %1584 = vsyncadd (!%p1437_p9), %s1086_s11, 4294966784  ;;  %s24_s29 = sadd.s32 1, %s1607_s29   ;;  %s2020_s24 = smov %s1591_s25 }
 0x13c   : > { %p21_p10 = scmp.ge.s32.totalorder %s24_s29, 4   ;;  %s2021_s25 = smov %s1595_s26 }
 0x13d   : > { %s2022_s26 = smov %s1709_s14  ;;  %s2023_s27 = smov %s1603_s28 }
 0x13e   : > { %s2024_s28 = smov %s2026_s9  ;;  %23 = sbr.rel (!%p21_p10) target bundleno = 8 (0x8), region = 117 }
 0x145   :  { %1091 = vsyncpa [#allocation3], 1 }
 0x146   :  { %1093 = vsyncpa [#allocation3 + $0x1], 1 }
 0x147   :  { %1094 = vsyncpa [#allocation5], 1 }
 0x148   :  { %1096 = vsyncpa [#allocation5 + $0x1], 1 }

</bundles_post_ra>
